<compile_context>
chip_gen: v5e
topology: v5e:2x2
jax: 0.10.0
libtpu: 0.0.40
codegen_flags: <defaults>
</compile_context>

<pallas_src>
import jax
import jax.numpy as jnp
from jax.experimental import pallas as pl
from jax.experimental.pallas import tpu as pltpu


# ----------------------------------------------------------------------------
# Kernel 1: ensemble parameter mean (runs once, tiled over (C, D)).
# ----------------------------------------------------------------------------
def _param_mean_kernel(w_ref, b_ref, wm_ref, bm_ref):
    # w_ref: (M, td, tc), b_ref: (M, tc) -> wm_ref: (td, tc), bm_ref: (1, tc)
    inv_m = 1.0 / w_ref.shape[0]  # static Python float (trace-time constant)
    # Reduce in the parameter dtype (f32) before any cast -> safe on v5e too.
    wm_ref[...] = (jnp.sum(w_ref[...], axis=0) * inv_m).astype(wm_ref.dtype)
    bm_ref[...] = (jnp.sum(b_ref[...], axis=0, keepdims=True) * inv_m).astype(
        bm_ref.dtype
    )


# ----------------------------------------------------------------------------
# Kernel 2: tiled matmul + bias (x @ w_mean + b_mean) with f32 accumulator.
# ----------------------------------------------------------------------------
def _matmul_bias_kernel(x_ref, w_ref, b_ref, o_ref, acc_ref):
    k = pl.program_id(2)

    @pl.when(k == 0)
    def _():
        acc_ref[...] = jnp.zeros_like(acc_ref)

    acc_ref[...] += jnp.dot(
        x_ref[...], w_ref[...], preferred_element_type=jnp.float32
    )

    @pl.when(k == pl.num_programs(2) - 1)
    def _():
        o_ref[...] = (acc_ref[...] + b_ref[...]).astype(o_ref.dtype)


# ----------------------------------------------------------------------------
# Tile / VMEM helpers.
# ----------------------------------------------------------------------------
def _largest_aligned_divisor(dim, cap):
    """Largest multiple of 128 <= cap that divides dim; fallback: full dim."""
    t = (cap // 128) * 128
    while t >= 128:
        if dim % t == 0:
            return t
        t -= 128
    return dim


def _vmem_limit(demand_bytes):
    # Generous headroom, clamped to the smallest physical VMEM (v7x: 64 MiB).
    return int(min(64 * 1024 * 1024, max(2 * demand_bytes, 32 * 1024 * 1024)))


# ----------------------------------------------------------------------------
# Wrapper.
# ----------------------------------------------------------------------------
def voting_ensemble(
    x, w_stack, b_stack, *, batch_tile=512, n_tile=256, k_tile=512, mxu_dtype=None
):
    """x: (B, D); w_stack: (M, D, C); b_stack: (M, C) -> (B, C) averaged logits."""
    B, D = x.shape
    M, D2, C = w_stack.shape
    assert D2 == D and b_stack.shape == (M, C)

    compute_dtype = mxu_dtype or x.dtype
    in_bytes = jnp.dtype(compute_dtype).itemsize
    out_bytes = jnp.dtype(x.dtype).itemsize

    # ---------------- Step 1: parameter mean (once, not per batch tile) -----
    td = D if D <= 256 else 256          # sublane dim: multiple of 8 or full
    tc = C if C <= 256 else 256          # lane dim: multiple of 128 or full
    mean_demand = (
        2 * M * (td * tc + tc) * w_stack.dtype.itemsize
        + 2 * (td * tc * in_bytes + tc * 4)
    )
    w_mean, b_mean = pl.pallas_call(
        _param_mean_kernel,
        out_shape=(
            jax.ShapeDtypeStruct((D, C), compute_dtype),
            jax.ShapeDtypeStruct((1, C), jnp.float32),
        ),
        grid_spec=pltpu.PrefetchScalarGridSpec(
            num_scalar_prefetch=0,
            grid=(pl.cdiv(C, tc), pl.cdiv(D, td)),
            in_specs=[
                pl.BlockSpec((M, td, tc), lambda jc, jd: (0, jd, jc)),
                pl.BlockSpec((M, tc), lambda jc, jd: (0, jc)),
            ],
            out_specs=[
                pl.BlockSpec((td, tc), lambda jc, jd: (jd, jc)),
                pl.BlockSpec((1, tc), lambda jc, jd: (0, jc)),
            ],
        ),
        compiler_params=pltpu.CompilerParams(
            dimension_semantics=("parallel", "arbitrary"),
            vmem_limit_bytes=_vmem_limit(mean_demand),
        ),
        cost_estimate=pl.CostEstimate(
            flops=M * D * C,
            transcendentals=0,
            bytes_accessed=M * (D * C + C) * 4 + (D * C) * in_bytes + C * 4,
        ),
    )(w_stack, b_stack)

    # ---------------- Step 2: tiled matmul + bias ----------------------------
    # Batch tile (sublane of x / out): multiple of 8; ragged last tile is safe.
    tb = B if B <= batch_tile else max(8, (batch_tile // 8) * 8)
    # N tile (lanes of out): multiple of 128; ragged last tile is safe.
    tn = C if C <= n_tile else max(128, (n_tile // 128) * 128)
    # K tile: must divide D exactly (padding along K would corrupt the sum).
    tk = D if D <= k_tile else _largest_aligned_divisor(D, k_tile)

    x_c = x if x.dtype == compute_dtype else x.astype(compute_dtype)

    mm_demand = (
        2 * (tb * tk + tk * tn + tn) * in_bytes  # double-buffered inputs
        + 2 * tb * tn * out_bytes                # double-buffered output
        + tb * tn * 4                            # f32 accumulator scratch
    )

    grid = (pl.cdiv(B, tb), pl.cdiv(C, tn), D // tk)

    out = pl.pallas_call(
        _matmul_bias_kernel,
        out_shape=jax.ShapeDtypeStruct((B, C), x.dtype),
        grid_spec=pltpu.PrefetchScalarGridSpec(
            num_scalar_prefetch=0,
            grid=grid,
            in_specs=[
                pl.BlockSpec((tb, tk), lambda i, j, k: (i, k)),   # x tile
                pl.BlockSpec((tk, tn), lambda i, j, k: (k, j)),   # w_mean tile
                pl.BlockSpec((1, tn), lambda i, j, k: (0, j)),    # b_mean tile
            ],
            out_specs=pl.BlockSpec((tb, tn), lambda i, j, k: (i, j)),
            scratch_shapes=[pltpu.VMEM((tb, tn), jnp.float32)],
        ),
        compiler_params=pltpu.CompilerParams(
            dimension_semantics=("parallel", "parallel", "arbitrary"),
            vmem_limit_bytes=_vmem_limit(mm_demand),
        ),
        cost_estimate=pl.CostEstimate(
            flops=2 * B * D * C,
            transcendentals=0,
            bytes_accessed=(B * D + D * C) * in_bytes + (B * C) * out_bytes + C * 4,
        ),
    )(x_c, w_mean, b_mean)

    return out


if __name__ == "__main__":
    key = jax.random.PRNGKey(0)
    B, D, C, M = 8, 32, 16, 3  # batch, hidden, classes, #ensemble-members

    kx, kw, kb = jax.random.split(key, 3)
    x = jax.random.normal(kx, (B, D), dtype=jnp.float32)
    # Deterministic synthetic parameters for the M linear ensemble members.
    w_stack = jax.random.normal(kw, (M, D, C), dtype=jnp.float32) * 0.1
    b_stack = jax.random.normal(kb, (M, C), dtype=jnp.float32) * 0.1

    out = voting_ensemble(x, w_stack, b_stack)
    jax.block_until_ready(out)

    # Reference (pure JAX): mean over models of (x @ W[m] + b[m]).
    ref = jnp.mean(
        jnp.einsum("bd,mdc->mbc", x, w_stack) + b_stack[:, None, :], axis=0
    )
    assert jnp.allclose(out, ref, atol=1e-5, rtol=1e-5)

    print("KERNEL_OK")
</pallas_src>

<mosaic_0001>
module attributes {stable_mosaic.version = 11 : i64} {
  func.func @_param_mean_kernel(%arg0: i32, %arg1: i32, %arg2: memref<3x32x16xf32, #tpu.memory_space<vmem>>, %arg3: memref<3x16xf32, #tpu.memory_space<vmem>>, %arg4: memref<32x16xf32, #tpu.memory_space<vmem>>, %arg5: memref<1x16xf32, #tpu.memory_space<vmem>>) attributes {dimension_semantics = [#tpu.dimension_semantics<parallel>, #tpu.dimension_semantics<arbitrary>], iteration_bounds = array<i64: 1, 1>, scalar_prefetch = 0 : i64, scratch_operands = 0 : i64, tpu.core_type = #tpu.core_type<tc>, window_params = [{transform_indices = @transform_0, window_bounds = array<i64: 3, 32, 16>}, {transform_indices = @transform_1, window_bounds = array<i64: 3, 16>}, {transform_indices = @transform_2, window_bounds = array<i64: 32, 16>}, {transform_indices = @transform_3, window_bounds = array<i64: 1, 16>}]} {
    %c0 = arith.constant 0 : index
    %c0_0 = arith.constant 0 : index
    %c0_1 = arith.constant 0 : index
    %0 = vector.load %arg2[%c0, %c0_0, %c0_1] : memref<3x32x16xf32, #tpu.memory_space<vmem>>, vector<3x32x16xf32>
    %cst = arith.constant dense<0.000000e+00> : vector<32x16xf32>
    %1 = vector.multi_reduction <add>, %0, %cst [0] : vector<3x32x16xf32> to vector<32x16xf32>
    %cst_2 = arith.constant 0.333333343 : f32
    %2 = vector.broadcast %cst_2 : f32 to vector<32x16xf32>
    %3 = arith.mulf %1, %2 : vector<32x16xf32>
    %c0_3 = arith.constant 0 : index
    %c0_4 = arith.constant 0 : index
    %4 = vector.load %arg4[%c0_3, %c0_4] : memref<32x16xf32, #tpu.memory_space<vmem>>, vector<32x16xf32>
    tpu.vector_store %arg4[%c0_3, %c0_4], %3 {strides = array<i32>} : memref<32x16xf32, #tpu.memory_space<vmem>>, vector<32x16xf32>,
    %c0_5 = arith.constant 0 : index
    %c0_6 = arith.constant 0 : index
    %5 = vector.load %arg3[%c0_5, %c0_6] : memref<3x16xf32, #tpu.memory_space<vmem>>, vector<3x16xf32>
    %cst_7 = arith.constant dense<0.000000e+00> : vector<16xf32>
    %6 = vector.multi_reduction <add>, %5, %cst_7 [0] : vector<3x16xf32> to vector<16xf32>
    %7 = vector.shape_cast %6 : vector<16xf32> to vector<1x16xf32>
    %cst_8 = arith.constant 0.333333343 : f32
    %8 = vector.broadcast %cst_8 : f32 to vector<1x16xf32>
    %9 = arith.mulf %7, %8 : vector<1x16xf32>
    %c0_9 = arith.constant 0 : index
    %c0_10 = arith.constant 0 : index
    %10 = vector.load %arg5[%c0_9, %c0_10] : memref<1x16xf32, #tpu.memory_space<vmem>>, vector<1x16xf32>
    tpu.vector_store %arg5[%c0_9, %c0_10], %9 {strides = array<i32>} : memref<1x16xf32, #tpu.memory_space<vmem>>, vector<1x16xf32>,
    return
  }
  func.func @transform_0(%arg0: i32, %arg1: i32) -> (i32, i32, i32) {
    %c0_i32 = arith.constant 0 : i32
    %c0_i32_0 = arith.constant 0 : i32
    return %c0_i32, %arg1, %arg0 : i32, i32, i32
  }
  func.func @transform_1(%arg0: i32, %arg1: i32) -> (i32, i32) {
    %c0_i32 = arith.constant 0 : i32
    %c0_i32_0 = arith.constant 0 : i32
    return %c0_i32, %arg0 : i32, i32
  }
  func.func @transform_2(%arg0: i32, %arg1: i32) -> (i32, i32) {
    %c0_i32 = arith.constant 0 : i32
    return %arg1, %arg0 : i32, i32
  }
  func.func @transform_3(%arg0: i32, %arg1: i32) -> (i32, i32) {
    %c0_i32 = arith.constant 0 : i32
    %c0_i32_0 = arith.constant 0 : i32
    return %c0_i32, %arg0 : i32, i32
  }
}

</mosaic_0001>

<bundles_post_ra>
// kernel: tpu_custom_call.1
= control target key start
LH: loop header
LB: loop body
LE: loop exit
PB: predicated region body
PF: predicated region fallthrough
CT: control target
= control target key end

     0   :  { %vm56_vm0 = vcmask 124928   ;;  %vm26_vm1 = vcmask 130048   ;;  %s205_s0 = inlined_call_operand.vmem [shape: f32[3,32,16], index: 0, kind: input, shape index: {}]   ;;  %s206_s1 = inlined_call_operand.vmem [shape: f32[3,16], index: 1, kind: input, shape index: {}]   ;;  %s207_s2 = inlined_call_operand.vmem [shape: f32[32,16], index: 2, kind: output, shape index: {0}]   ;;  %s208_s3 = inlined_call_operand.hbm [shape: f32[1,16], index: 3, kind: output, shape index: {1}]  }
   0x1   :  { %v55_v0 = vld [vmem:[%s206_s1] sm:$0x7]  ;;  %v15_v5 = vld [vmem:[%s205_s0 + $0x8] sm:$0xff]  ;;  %v16_v12 = vld [vmem:[%s205_s0 + $0x10] sm:$0xff] }
   0x2   :  { %v14_v1 = vld [vmem:[%s205_s0] sm:$0xff]  ;;  %v57_v3 = vsel %vm56_vm0, %v55_v0, 0.0  ;;  %v19_v6 = vld [vmem:[%s205_s0 + $0x28] sm:$0xff]  ;;  %v32_v14 = vsel %vm26_vm1, %v15_v5, 0.0  ;;  %v20_v17 = vld [vmem:[%s205_s0 + $0x30] sm:$0xff]  ;;  %v37_v22 = vsel %vm26_vm1, %v16_v12, 0.0 }
   0x3   :  { %v18_v2 = vld [vmem:[%s205_s0 + $0x20] sm:$0xff]  ;;  %v58_v7 = vrot.slane %v57_v3, 4  ;;  %v27_v8 = vsel %vm26_vm1, %v14_v1, 0.0  ;;  %v23_v11 = vld [vmem:[%s205_s0 + $0x48] sm:$0xff]  ;;  %v33_v15 = vsel %vm26_vm1, %v19_v6, 0.0  ;;  %v24_v18 = vld [vmem:[%s205_s0 + $0x50] sm:$0xff] }
   0x4   :  { %v22_v4 = vld [vmem:[%s205_s0 + $0x40] sm:$0xff]  ;;  %v28_v9 = vsel %vm26_vm1, %v18_v2, 0.0  ;;  %v35_v16 = vsel %vm26_vm1, %v23_v11, 0.0  ;;  %v17_v19 = vld [vmem:[%s205_s0 + $0x18] sm:$0xff]  ;;  %v34_v21 = vadd.f32 %v33_v15, %v32_v14  ;;  %v38_v23 = vsel %vm26_vm1, %v20_v17, 0.0 }
   0x5   :  { %v30_v10 = vsel %vm26_vm1, %v22_v4, 0.0  ;;  %v29_v13 = vadd.f32 %v28_v9, %v27_v8  ;;  %v59_v20 = vadd.f32 %v58_v7, %v57_v3  ;;  %v21_v24 = vld [vmem:[%s205_s0 + $0x38] sm:$0xff] }
   0x6   :  { %v25_v25 = vld [vmem:[%s205_s0 + $0x58] sm:$0xff] }
   0x7   :  { %9 = vsyncpa [#allocation3], 0  ;;  %v31_v26 = vadd.f32 %v30_v10, %v29_v13  ;;  %v39_v27 = vadd.f32 %v38_v23, %v37_v22  ;;  %v40_v28 = vsel %vm26_vm1, %v24_v18, 0.0  ;;  %v42_v29 = vsel %vm26_vm1, %v17_v19, 0.0  ;;  %s114_s15 = smov [#allocation2]   ;;  %s76_s19 = sshll.u32 %s208_s3, 4  ;;  %s77_s19 = int_to_ptr.hbm [resolvable:$true] %s76_s19 }
   0x8   :  { %v60_v30 = vrot.slane %v59_v20, 2  ;;  %v36_v31 = vadd.f32 %v35_v16, %v34_v21  ;;  %v43_v32 = vsel %vm26_vm1, %v21_v24, 0.0  ;;  %v45_v33 = vsel %vm26_vm1, %v25_v25, 0.0  ;;  %s74_s16 = sshll.u32 %s114_s15, 4  ;;  %s75_s16 = int_to_ptr.vmem [resolvable:$true] %s74_s16 }
   0x9   :  { %v47_v34 = vmul.f32 0.33333334, %v31_v26  ;;  %v41_v35 = vadd.f32 %v40_v28, %v39_v27  ;;  %v44_v36 = vadd.f32 %v43_v32, %v42_v29  ;;  %vm65_vm2 = vcmask 122880  }
   0xa   :  { %v61_v37 = vadd.f32 %v60_v30, %v59_v20  ;;  %v48_v38 = vmul.f32 0.33333334, %v36_v31 }
   0xb   :  { %51 = vst.msk [vmem:[%s207_s2] sm:$0xff] %vm26_vm1, %v47_v34  ;;  %v49_v39 = vmul.f32 0.33333334, %v41_v35  ;;  %v46_v40 = vadd.f32 %v45_v33, %v44_v36 }
   0xc   :  { %v62_v41 = vrot.slane %v61_v37, 1  ;;  %52 = vst.msk [vmem:[%s207_s2 + $0x8] sm:$0xff] %vm26_vm1, %v48_v38 }
   0xd   :  { %53 = vst.msk [vmem:[%s207_s2 + $0x10] sm:$0xff] %vm26_vm1, %v49_v39  ;;  %v50_v42 = vmul.f32 0.33333334, %v46_v40 }
   0xe   :  { %v63_v43 = vadd.f32 %v62_v41, %v61_v37 }
   0xf   :  { %54 = vst.msk [vmem:[%s207_s2 + $0x18] sm:$0xff] %vm26_vm1, %v50_v42 }
  0x10   :  { %v64_v44 = vmul.f32 0.33333334, %v63_v43 }
  0x12   :  { %66 = vst.msk [vmem:[#allocation2] sm:$0x1] %vm65_vm2, %v64_v44 }
  0x13   :  { %79 = dma.vmem_to_hbm [thread:$0]  %s75_s16, 16, %s77_s19, [#allocation3]  }
  0x14   :  { %112 = dma.done.wait [#allocation3], 16  }
  0x15   :  { %113 = vsyncadd [#allocation3], 4294967280 }
  0x16   :  { %86 = vsyncpa [#allocation3], 1 }

</bundles_post_ra>
